<compile_context>
chip_gen: v7x
topology: tpu7x:2x2x1
jax: 0.10.0
libtpu: 0.0.40
codegen_flags: <defaults>
</compile_context>

<pallas_src>
import functools

import jax
import jax.numpy as jnp
import numpy as np
from jax import lax
from jax.experimental import pallas as pl
from jax.experimental.pallas import tpu as pltpu


# ----------------------------- Pallas kernel --------------------------------

def _basic_block_kernel(*refs, H, W, Cin, Cout, is_proj):
    """One image per grid step.

    Activations are lane-dense 2-D slabs:
      x_ref   : (H+2, (W+2)*Cin)  f32   zero-padded input image
      w1_ref  : (3, (W+2)*Cin,  W*Cout) bf16 banded conv1 weights (per kh)
      w2_ref  : (3, (W+2)*Cout, W*Cout) bf16 banded conv2 weights (per kh)
      s*/b*   : (1, W*Cout) f32         folded BN scale / bias (tiled over W)
      wsc_ref : (W*Cin, W*Cout) bf16    block-diag 1x1 shortcut (proj only)
      out_ref : (H, W*Cout) f32
      mid_ref : VMEM scratch (H+2, (W+2)*Cout) bf16, padded conv1 output
    """
    if is_proj:
        (x_ref, w1_ref, s1_ref, b1_ref, w2_ref, s2_ref, b2_ref,
         wsc_ref, ssc_ref, bsc_ref, out_ref, mid_ref) = refs
    else:
        (x_ref, w1_ref, s1_ref, b1_ref, w2_ref, s2_ref, b2_ref,
         out_ref, mid_ref) = refs

    Hp = H + 2
    WCo = W * Cout
    WpCo = (W + 2) * Cout

    # Cast activations to bf16 once at the MXU boundary (accumulate in f32).
    xb = x_ref[...].astype(jnp.bfloat16)                    # (Hp, (W+2)*Cin)

    # ---- conv1: 3 banded matmuls (kw taps + channels folded into K) --------
    acc1 = jnp.zeros((H, WCo), jnp.float32)
    for kh in range(3):
        acc1 += jnp.dot(xb[kh:kh + H, :], w1_ref[kh],
                        preferred_element_type=jnp.float32)
    # bn1 (folded) + relu1, in f32
    y1 = jnp.maximum(acc1 * s1_ref[...] + b1_ref[...], 0.0)

    # ---- padded intermediate in VMEM scratch --------------------------------
    # Zero only the 1-pixel halo ring (re-done every step -> megacore-safe),
    # then store the interior once.
    zrow = jnp.zeros((1, WpCo), mid_ref.dtype)
    mid_ref[0:1, :] = zrow
    mid_ref[Hp - 1:Hp, :] = zrow
    zcol = jnp.zeros((Hp, Cout), mid_ref.dtype)
    mid_ref[:, 0:Cout] = zcol
    mid_ref[:, WpCo - Cout:WpCo] = zcol
    mid_ref[1:H + 1, Cout:WpCo - Cout] = y1.astype(mid_ref.dtype)

    # ---- conv2 + bn2 ---------------------------------------------------------
    acc2 = jnp.zeros((H, WCo), jnp.float32)
    for kh in range(3):
        acc2 += jnp.dot(mid_ref[kh:kh + H, :], w2_ref[kh],
                        preferred_element_type=jnp.float32)
    y2 = acc2 * s2_ref[...] + b2_ref[...]

    # ---- shortcut ------------------------------------------------------------
    if is_proj:
        xin = xb[1:H + 1, Cin:(W + 1) * Cin]                 # (H, W*Cin) bf16
        sc = jnp.dot(xin, wsc_ref[...], preferred_element_type=jnp.float32)
        sc = sc * ssc_ref[...] + bsc_ref[...]
    else:
        # Identity shortcut: exact f32 interior slice, no matmul at all.
        sc = x_ref[1:H + 1, Cin:(W + 1) * Cin]

    out_ref[...] = jnp.maximum(y2 + sc, 0.0)                 # residual + relu2


# ------------------------- weight folding (one-time) -------------------------

def _banded_conv_weights(w_oihw, W):
    """3x3 conv weights (O,I,3,3) -> 3 banded matrices ((W+2)*I, W*O), one per
    kh, so the kw taps and the channel dim are folded into the MXU K axis."""
    cout, cin, KH, KW = w_oihw.shape
    w = np.asarray(jnp.transpose(w_oihw, (2, 3, 1, 0)))      # (3,3,cin,cout)
    Wp = W + 2
    b = np.zeros((KH, Wp * cin, W * cout), np.float32)
    for kh in range(KH):
        for kw in range(KW):
            for wc in range(W):
                b[kh, (wc + kw) * cin:(wc + kw + 1) * cin,
                      wc * cout:(wc + 1) * cout] = w[kh, kw]
    return jnp.asarray(b)


def _blockdiag_1x1(wsc_oi, W):
    """1x1 conv weights (O,I) -> block-diagonal (W*I, W*O) matrix."""
    cout, cin = wsc_oi.shape
    wt = np.asarray(wsc_oi).T                                # (cin, cout)
    m = np.zeros((W * cin, W * cout), np.float32)
    for wc in range(W):
        m[wc * cin:(wc + 1) * cin, wc * cout:(wc + 1) * cout] = wt
    return jnp.asarray(m)


def prepare_kernel_params(params, H, W):
    """Fold weights/BN into the lane-dense banded layout used by the kernel."""
    Cout, Cin = params["w1"].shape[0], params["w1"].shape[1]
    if not params["is_proj"]:
        assert Cin == Cout
    tile = lambda v: jnp.tile(v.astype(jnp.float32), W).reshape(1, W * Cout)
    kp = dict(stride=params["stride"], is_proj=params["is_proj"],
              H=H, W=W, Cin=Cin, Cout=Cout,
              w1b=_banded_conv_weights(params["w1"], W).astype(jnp.bfloat16),
              w2b=_banded_conv_weights(params["w2"], W).astype(jnp.bfloat16),
              s1=tile(params["s1"]), b1=tile(params["b1"]),
              s2=tile(params["s2"]), b2=tile(params["b2"]))
    if params["is_proj"]:
        kp["wscb"] = _blockdiag_1x1(params["wsc"][:, :, 0, 0],
                                    W).astype(jnp.bfloat16)
        kp["ssc"], kp["bsc"] = tile(params["ssc"]), tile(params["bsc"])
    return kp


# --------------------------------- wrapper ------------------------------------

def basic_block_forward(x_nchw, kp):
    # TODO(synk): stride > 1 not implemented in the Pallas kernel.
    assert kp["stride"] == 1, "Pallas kernel only implements stride=1"
    H, W, Cin, Cout = kp["H"], kp["W"], kp["Cin"], kp["Cout"]
    N = x_nchw.shape[0]
    Hp, Wp = H + 2, W + 2
    WCo = W * Cout

    # NCHW -> NHWC, spatial zero-pad, flatten (W, C) onto the lane axis.
    # TODO(synk): the pad could be folded into the kernel with halo-aware
    # index_maps; kept in the wrapper where XLA fuses it with the transpose.
    x = jnp.transpose(x_nchw, (0, 2, 3, 1)).astype(jnp.float32)
    xpad = jnp.pad(x, ((0, 0), (1, 1), (1, 1), (0, 0))).reshape(N, Hp, Wp * Cin)

    kern = functools.partial(_basic_block_kernel, H=H, W=W, Cin=Cin,
                             Cout=Cout, is_proj=kp["is_proj"])

    pinned = lambda shape: pl.BlockSpec(shape, lambda n, _s=shape: (0,) * len(_s))
    in_specs = [
        pl.BlockSpec((None, Hp, Wp * Cin), lambda n: (n, 0, 0)),   # x (per image)
        pinned((3, Wp * Cin, WCo)),                                # w1 banded
        pinned((1, WCo)), pinned((1, WCo)),                        # s1, b1
        pinned((3, Wp * Cout, WCo)),                               # w2 banded
        pinned((1, WCo)), pinned((1, WCo)),                        # s2, b2
    ]
    args = [xpad, kp["w1b"], kp["s1"], kp["b1"], kp["w2b"], kp["s2"], kp["b2"]]
    if kp["is_proj"]:
        in_specs += [pinned((W * Cin, WCo)), pinned((1, WCo)), pinned((1, WCo))]
        args += [kp["wscb"], kp["ssc"], kp["bsc"]]

    out_flat = pl.pallas_call(
        kern,
        out_shape=jax.ShapeDtypeStruct((N, H, WCo), jnp.float32),
        grid=(N,),
        in_specs=in_specs,
        out_specs=pl.BlockSpec((None, H, WCo), lambda n: (n, 0, 0)),
        scratch_shapes=[pltpu.VMEM((Hp, Wp * Cout), jnp.bfloat16)],
        compiler_params=pltpu.CompilerParams(
            dimension_semantics=("parallel",)),
    )(*args)

    out = out_flat.reshape(N, H, W, Cout)
    return jnp.transpose(out, (0, 3, 1, 2))                  # NHWC -> NCHW


# --------------------------- params & reference ------------------------------

def init_params(key, cin, cout, stride=1):
    ks = jax.random.split(key, 6)

    def bn_fold(k, c):
        k1, k2, k3, k4 = jax.random.split(k, 4)
        gamma = jax.random.uniform(k1, (c,), jnp.float32, 0.5, 1.5)
        beta = jax.random.normal(k2, (c,), jnp.float32) * 0.1
        mean = jax.random.normal(k3, (c,), jnp.float32) * 0.1
        var = jax.random.uniform(k4, (c,), jnp.float32, 0.5, 1.5)
        scale = gamma / jnp.sqrt(var + 1e-5)
        bias = beta - mean * scale
        return scale, bias

    w1 = jax.random.normal(ks[0], (cout, cin, 3, 3), jnp.float32) * 0.2
    w2 = jax.random.normal(ks[1], (cout, cout, 3, 3), jnp.float32) * 0.2
    s1, b1 = bn_fold(ks[2], cout)
    s2, b2 = bn_fold(ks[3], cout)

    is_proj = (stride != 1) or (cin != cout)
    if is_proj:
        wsc = jax.random.normal(ks[4], (cout, cin, 1, 1), jnp.float32) * 0.2
        ssc, bsc = bn_fold(ks[5], cout)
    else:
        wsc = jnp.eye(cin, dtype=jnp.float32)[:, :, None, None]
        ssc = jnp.ones((cout,), jnp.float32)
        bsc = jnp.zeros((cout,), jnp.float32)

    return dict(w1=w1, w2=w2, wsc=wsc, s1=s1, b1=b1, s2=s2, b2=b2,
                ssc=ssc, bsc=bsc, stride=stride, is_proj=is_proj)


def ref_forward(x, p):
    """Pure-JAX reference (XLA convs) for correctness checking."""
    def conv(a, w, stride):
        kh, kw = w.shape[2], w.shape[3]
        return lax.conv_general_dilated(
            a, w, (stride, stride),
            padding=[(kh // 2, kh // 2), (kw // 2, kw // 2)],
            dimension_numbers=("NCHW", "OIHW", "NCHW"))

    def bn(a, s, b):
        return a * s[None, :, None, None] + b[None, :, None, None]

    y = jnp.maximum(bn(conv(x, p["w1"], p["stride"]), p["s1"], p["b1"]), 0.0)
    y = bn(conv(y, p["w2"], 1), p["s2"], p["b2"])
    if p["is_proj"]:
        sc = bn(conv(x, p["wsc"], p["stride"]), p["ssc"], p["bsc"])
    else:
        sc = x
    return jnp.maximum(y + sc, 0.0)


# --------------------------------- main ---------------------------------------

if __name__ == "__main__":
    key = jax.random.PRNGKey(0)
    kx, kpa, kpb = jax.random.split(key, 3)

    x = jax.random.normal(kx, (2, 4, 16, 16), jnp.float32)    # NCHW

    # Case 1: BasicBlock(4, 4, stride=1) -> identity shortcut
    params = init_params(kpa, cin=4, cout=4, stride=1)
    kparams = prepare_kernel_params(params, H=16, W=16)
    out = jax.block_until_ready(basic_block_forward(x, kparams))
    ref = jax.block_until_ready(ref_forward(x, params))
    assert out.shape == ref.shape == (2, 4, 16, 16)
    err = float(jnp.max(jnp.abs(out - ref)))
    assert jnp.allclose(out, ref, rtol=2e-2, atol=2e-2), f"identity max_err={err}"

    # Case 2: BasicBlock(4, 8, stride=1) -> projection (1x1 conv + BN) shortcut
    params2 = init_params(kpb, cin=4, cout=8, stride=1)
    kparams2 = prepare_kernel_params(params2, H=16, W=16)
    out2 = jax.block_until_ready(basic_block_forward(x, kparams2))
    ref2 = jax.block_until_ready(ref_forward(x, params2))
    assert out2.shape == ref2.shape == (2, 8, 16, 16)
    err2 = float(jnp.max(jnp.abs(out2 - ref2)))
    assert jnp.allclose(out2, ref2, rtol=2e-2, atol=2e-2), f"proj max_err={err2}"

    print("KERNEL_OK")
</pallas_src>

<mosaic_0001>
module attributes {stable_mosaic.version = 11 : i64} {
  func.func @_basic_block_kernel(%arg0: i32, %arg1: memref<1x18x72xf32, #tpu.memory_space<vmem>>, %arg2: memref<3x72x64xbf16, #tpu.memory_space<vmem>>, %arg3: memref<1x64xf32, #tpu.memory_space<vmem>>, %arg4: memref<1x64xf32, #tpu.memory_space<vmem>>, %arg5: memref<3x72x64xbf16, #tpu.memory_space<vmem>>, %arg6: memref<1x64xf32, #tpu.memory_space<vmem>>, %arg7: memref<1x64xf32, #tpu.memory_space<vmem>>, %arg8: memref<1x16x64xf32, #tpu.memory_space<vmem>>, %arg9: memref<18x72xbf16, #tpu.memory_space<vmem>>) attributes {dimension_semantics = [#tpu.dimension_semantics<parallel>], iteration_bounds = array<i64: 2>, scalar_prefetch = 0 : i64, scratch_operands = 1 : i64, tpu.core_type = #tpu.core_type<tc>, window_params = [{transform_indices = @transform_0, window_bounds = array<i64: 1, 18, 72>}, {pipeline_mode = #tpu.pipeline_mode<synchronous>, transform_indices = @transform_1, window_bounds = array<i64: 3, 72, 64>}, {pipeline_mode = #tpu.pipeline_mode<synchronous>, transform_indices = @transform_2, window_bounds = array<i64: 1, 64>}, {pipeline_mode = #tpu.pipeline_mode<synchronous>, transform_indices = @transform_3, window_bounds = array<i64: 1, 64>}, {pipeline_mode = #tpu.pipeline_mode<synchronous>, transform_indices = @transform_4, window_bounds = array<i64: 3, 72, 64>}, {pipeline_mode = #tpu.pipeline_mode<synchronous>, transform_indices = @transform_5, window_bounds = array<i64: 1, 64>}, {pipeline_mode = #tpu.pipeline_mode<synchronous>, transform_indices = @transform_6, window_bounds = array<i64: 1, 64>}, {transform_indices = @transform_7, window_bounds = array<i64: 1, 16, 64>}]} {
    %c0 = arith.constant 0 : index
    %c0_0 = arith.constant 0 : index
    %c0_1 = arith.constant 0 : index
    %0 = vector.load %arg1[%c0, %c0_0, %c0_1] : memref<1x18x72xf32, #tpu.memory_space<vmem>>, vector<1x18x72xf32>
    %1 = vector.shape_cast %0 : vector<1x18x72xf32> to vector<18x72xf32>
    %2 = arith.truncf %1 : vector<18x72xf32> to vector<18x72xbf16>
    %cst = arith.constant 0.000000e+00 : f32
    %3 = vector.broadcast %cst : f32 to vector<16x64xf32>
    %4 = vector.extract_strided_slice %2 {offsets = [0, 0], sizes = [16, 72], strides = [1, 1]} : vector<18x72xbf16> to vector<16x72xbf16>
    %c0_2 = arith.constant 0 : index
    %c0_3 = arith.constant 0 : index
    %c0_4 = arith.constant 0 : index
    %5 = vector.load %arg2[%c0_2, %c0_3, %c0_4] : memref<3x72x64xbf16, #tpu.memory_space<vmem>>, vector<1x72x64xbf16>
    %6 = vector.shape_cast %5 : vector<1x72x64xbf16> to vector<72x64xbf16>
    %cst_5 = arith.constant dense<0.000000e+00> : vector<16x64xf32>
    %7 = tpu.matmul %4, %6, %cst_5 {dimension_numbers = #tpu.dot_dimension_numbers<[1], [0], [0], [1], [0, 0, 1, 1], [], []>} : vector<16x72xbf16>, vector<72x64xbf16>, vector<16x64xf32> -> vector<16x64xf32>
    %8 = arith.addf %3, %7 : vector<16x64xf32>
    %9 = vector.extract_strided_slice %2 {offsets = [1, 0], sizes = [16, 72], strides = [1, 1]} : vector<18x72xbf16> to vector<16x72xbf16>
    %c1 = arith.constant 1 : index
    %c0_6 = arith.constant 0 : index
    %c0_7 = arith.constant 0 : index
    %10 = vector.load %arg2[%c1, %c0_6, %c0_7] : memref<3x72x64xbf16, #tpu.memory_space<vmem>>, vector<1x72x64xbf16>
    %11 = vector.shape_cast %10 : vector<1x72x64xbf16> to vector<72x64xbf16>
    %cst_8 = arith.constant dense<0.000000e+00> : vector<16x64xf32>
    %12 = tpu.matmul %9, %11, %cst_8 {dimension_numbers = #tpu.dot_dimension_numbers<[1], [0], [0], [1], [0, 0, 1, 1], [], []>} : vector<16x72xbf16>, vector<72x64xbf16>, vector<16x64xf32> -> vector<16x64xf32>
    %13 = arith.addf %8, %12 : vector<16x64xf32>
    %14 = vector.extract_strided_slice %2 {offsets = [2, 0], sizes = [16, 72], strides = [1, 1]} : vector<18x72xbf16> to vector<16x72xbf16>
    %c2 = arith.constant 2 : index
    %c0_9 = arith.constant 0 : index
    %c0_10 = arith.constant 0 : index
    %15 = vector.load %arg2[%c2, %c0_9, %c0_10] : memref<3x72x64xbf16, #tpu.memory_space<vmem>>, vector<1x72x64xbf16>
    %16 = vector.shape_cast %15 : vector<1x72x64xbf16> to vector<72x64xbf16>
    %cst_11 = arith.constant dense<0.000000e+00> : vector<16x64xf32>
    %17 = tpu.matmul %14, %16, %cst_11 {dimension_numbers = #tpu.dot_dimension_numbers<[1], [0], [0], [1], [0, 0, 1, 1], [], []>} : vector<16x72xbf16>, vector<72x64xbf16>, vector<16x64xf32> -> vector<16x64xf32>
    %18 = arith.addf %13, %17 : vector<16x64xf32>
    %c0_12 = arith.constant 0 : index
    %c0_13 = arith.constant 0 : index
    %19 = vector.load %arg3[%c0_12, %c0_13] : memref<1x64xf32, #tpu.memory_space<vmem>>, vector<1x64xf32>
    %20 = vector.broadcast %19 : vector<1x64xf32> to vector<16x64xf32>
    %21 = arith.mulf %18, %20 : vector<16x64xf32>
    %c0_14 = arith.constant 0 : index
    %c0_15 = arith.constant 0 : index
    %22 = vector.load %arg4[%c0_14, %c0_15] : memref<1x64xf32, #tpu.memory_space<vmem>>, vector<1x64xf32>
    %23 = vector.broadcast %22 : vector<1x64xf32> to vector<16x64xf32>
    %24 = arith.addf %21, %23 : vector<16x64xf32>
    %cst_16 = arith.constant 0.000000e+00 : f32
    %25 = vector.broadcast %cst_16 : f32 to vector<16x64xf32>
    %26 = arith.maximumf %24, %25 : vector<16x64xf32>
    %cst_17 = arith.constant 0.000000e+00 : bf16
    %27 = vector.broadcast %cst_17 : bf16 to vector<1x72xbf16>
    %c0_18 = arith.constant 0 : index
    %c0_19 = arith.constant 0 : index
    %28 = vector.load %arg9[%c0_18, %c0_19] : memref<18x72xbf16, #tpu.memory_space<vmem>>, vector<1x72xbf16>
    tpu.vector_store %arg9[%c0_18, %c0_19], %27 {strides = array<i32>} : memref<18x72xbf16, #tpu.memory_space<vmem>>, vector<1x72xbf16>,
    %c17 = arith.constant 17 : index
    %c0_20 = arith.constant 0 : index
    %29 = vector.load %arg9[%c17, %c0_20] : memref<18x72xbf16, #tpu.memory_space<vmem>>, vector<1x72xbf16>
    tpu.vector_store %arg9[%c17, %c0_20], %27 {strides = array<i32>} : memref<18x72xbf16, #tpu.memory_space<vmem>>, vector<1x72xbf16>,
    %cst_21 = arith.constant 0.000000e+00 : bf16
    %30 = vector.broadcast %cst_21 : bf16 to vector<18x4xbf16>
    %c0_22 = arith.constant 0 : index
    %c0_23 = arith.constant 0 : index
    %31 = vector.load %arg9[%c0_22, %c0_23] : memref<18x72xbf16, #tpu.memory_space<vmem>>, vector<18x4xbf16>
    tpu.vector_store %arg9[%c0_22, %c0_23], %30 {strides = array<i32>} : memref<18x72xbf16, #tpu.memory_space<vmem>>, vector<18x4xbf16>,
    %c0_24 = arith.constant 0 : index
    %c68 = arith.constant 68 : index
    %32 = vector.load %arg9[%c0_24, %c68] : memref<18x72xbf16, #tpu.memory_space<vmem>>, vector<18x4xbf16>
    tpu.vector_store %arg9[%c0_24, %c68], %30 {strides = array<i32>} : memref<18x72xbf16, #tpu.memory_space<vmem>>, vector<18x4xbf16>,
    %33 = arith.truncf %26 : vector<16x64xf32> to vector<16x64xbf16>
    %c1_25 = arith.constant 1 : index
    %c4 = arith.constant 4 : index
    %34 = vector.load %arg9[%c1_25, %c4] : memref<18x72xbf16, #tpu.memory_space<vmem>>, vector<16x64xbf16>
    tpu.vector_store %arg9[%c1_25, %c4], %33 {strides = array<i32>} : memref<18x72xbf16, #tpu.memory_space<vmem>>, vector<16x64xbf16>,
    %cst_26 = arith.constant 0.000000e+00 : f32
    %35 = vector.broadcast %cst_26 : f32 to vector<16x64xf32>
    %c0_27 = arith.constant 0 : index
    %c0_28 = arith.constant 0 : index
    %36 = vector.load %arg9[%c0_27, %c0_28] : memref<18x72xbf16, #tpu.memory_space<vmem>>, vector<16x72xbf16>
    %c0_29 = arith.constant 0 : index
    %c0_30 = arith.constant 0 : index
    %c0_31 = arith.constant 0 : index
    %37 = vector.load %arg5[%c0_29, %c0_30, %c0_31] : memref<3x72x64xbf16, #tpu.memory_space<vmem>>, vector<1x72x64xbf16>
    %38 = vector.shape_cast %37 : vector<1x72x64xbf16> to vector<72x64xbf16>
    %cst_32 = arith.constant dense<0.000000e+00> : vector<16x64xf32>
    %39 = tpu.matmul %36, %38, %cst_32 {dimension_numbers = #tpu.dot_dimension_numbers<[1], [0], [0], [1], [0, 0, 1, 1], [], []>} : vector<16x72xbf16>, vector<72x64xbf16>, vector<16x64xf32> -> vector<16x64xf32>
    %40 = arith.addf %35, %39 : vector<16x64xf32>
    %c1_33 = arith.constant 1 : index
    %c0_34 = arith.constant 0 : index
    %41 = vector.load %arg9[%c1_33, %c0_34] : memref<18x72xbf16, #tpu.memory_space<vmem>>, vector<16x72xbf16>
    %c1_35 = arith.constant 1 : index
    %c0_36 = arith.constant 0 : index
    %c0_37 = arith.constant 0 : index
    %42 = vector.load %arg5[%c1_35, %c0_36, %c0_37] : memref<3x72x64xbf16, #tpu.memory_space<vmem>>, vector<1x72x64xbf16>
    %43 = vector.shape_cast %42 : vector<1x72x64xbf16> to vector<72x64xbf16>
    %cst_38 = arith.constant dense<0.000000e+00> : vector<16x64xf32>
    %44 = tpu.matmul %41, %43, %cst_38 {dimension_numbers = #tpu.dot_dimension_numbers<[1], [0], [0], [1], [0, 0, 1, 1], [], []>} : vector<16x72xbf16>, vector<72x64xbf16>, vector<16x64xf32> -> vector<16x64xf32>
    %45 = arith.addf %40, %44 : vector<16x64xf32>
    %c2_39 = arith.constant 2 : index
    %c0_40 = arith.constant 0 : index
    %46 = vector.load %arg9[%c2_39, %c0_40] : memref<18x72xbf16, #tpu.memory_space<vmem>>, vector<16x72xbf16>
    %c2_41 = arith.constant 2 : index
    %c0_42 = arith.constant 0 : index
    %c0_43 = arith.constant 0 : index
    %47 = vector.load %arg5[%c2_41, %c0_42, %c0_43] : memref<3x72x64xbf16, #tpu.memory_space<vmem>>, vector<1x72x64xbf16>
    %48 = vector.shape_cast %47 : vector<1x72x64xbf16> to vector<72x64xbf16>
    %cst_44 = arith.constant dense<0.000000e+00> : vector<16x64xf32>
    %49 = tpu.matmul %46, %48, %cst_44 {dimension_numbers = #tpu.dot_dimension_numbers<[1], [0], [0], [1], [0, 0, 1, 1], [], []>} : vector<16x72xbf16>, vector<72x64xbf16>, vector<16x64xf32> -> vector<16x64xf32>
    %50 = arith.addf %45, %49 : vector<16x64xf32>
    %c0_45 = arith.constant 0 : index
    %c0_46 = arith.constant 0 : index
    %51 = vector.load %arg6[%c0_45, %c0_46] : memref<1x64xf32, #tpu.memory_space<vmem>>, vector<1x64xf32>
    %52 = vector.broadcast %51 : vector<1x64xf32> to vector<16x64xf32>
    %53 = arith.mulf %50, %52 : vector<16x64xf32>
    %c0_47 = arith.constant 0 : index
    %c0_48 = arith.constant 0 : index
    %54 = vector.load %arg7[%c0_47, %c0_48] : memref<1x64xf32, #tpu.memory_space<vmem>>, vector<1x64xf32>
    %55 = vector.broadcast %54 : vector<1x64xf32> to vector<16x64xf32>
    %56 = arith.addf %53, %55 : vector<16x64xf32>
    %c0_49 = arith.constant 0 : index
    %c1_50 = arith.constant 1 : index
    %c4_51 = arith.constant 4 : index
    %57 = vector.load %arg1[%c0_49, %c1_50, %c4_51] : memref<1x18x72xf32, #tpu.memory_space<vmem>>, vector<1x16x64xf32>
    %58 = vector.shape_cast %57 : vector<1x16x64xf32> to vector<16x64xf32>
    %59 = arith.addf %56, %58 : vector<16x64xf32>
    %cst_52 = arith.constant 0.000000e+00 : f32
    %60 = vector.broadcast %cst_52 : f32 to vector<16x64xf32>
    %61 = arith.maximumf %59, %60 : vector<16x64xf32>
    %c0_53 = arith.constant 0 : index
    %c0_54 = arith.constant 0 : index
    %c0_55 = arith.constant 0 : index
    %62 = vector.load %arg8[%c0_53, %c0_54, %c0_55] : memref<1x16x64xf32, #tpu.memory_space<vmem>>, vector<1x16x64xf32>
    %63 = vector.shape_cast %62 : vector<1x16x64xf32> to vector<16x64xf32>
    %64 = vector.shape_cast %61 : vector<16x64xf32> to vector<1x16x64xf32>
    tpu.vector_store %arg8[%c0_53, %c0_54, %c0_55], %64 {strides = array<i32>} : memref<1x16x64xf32, #tpu.memory_space<vmem>>, vector<1x16x64xf32>,
    return
  }
  func.func @transform_0(%arg0: i32) -> (i32, i32, i32) {
    %c0_i32 = arith.constant 0 : i32
    %c0_i32_0 = arith.constant 0 : i32
    %c0_i32_1 = arith.constant 0 : i32
    return %arg0, %c0_i32, %c0_i32_0 : i32, i32, i32
  }
  func.func @transform_1(%arg0: i32) -> (i32, i32, i32) {
    %c0_i32 = arith.constant 0 : i32
    %c0_i32_0 = arith.constant 0 : i32
    %c0_i32_1 = arith.constant 0 : i32
    %c0_i32_2 = arith.constant 0 : i32
    return %c0_i32, %c0_i32_0, %c0_i32_1 : i32, i32, i32
  }
  func.func @transform_2(%arg0: i32) -> (i32, i32) {
    %c0_i32 = arith.constant 0 : i32
    %c0_i32_0 = arith.constant 0 : i32
    %c0_i32_1 = arith.constant 0 : i32
    return %c0_i32, %c0_i32_0 : i32, i32
  }
  func.func @transform_3(%arg0: i32) -> (i32, i32) {
    %c0_i32 = arith.constant 0 : i32
    %c0_i32_0 = arith.constant 0 : i32
    %c0_i32_1 = arith.constant 0 : i32
    return %c0_i32, %c0_i32_0 : i32, i32
  }
  func.func @transform_4(%arg0: i32) -> (i32, i32, i32) {
    %c0_i32 = arith.constant 0 : i32
    %c0_i32_0 = arith.constant 0 : i32
    %c0_i32_1 = arith.constant 0 : i32
    %c0_i32_2 = arith.constant 0 : i32
    return %c0_i32, %c0_i32_0, %c0_i32_1 : i32, i32, i32
  }
  func.func @transform_5(%arg0: i32) -> (i32, i32) {
    %c0_i32 = arith.constant 0 : i32
    %c0_i32_0 = arith.constant 0 : i32
    %c0_i32_1 = arith.constant 0 : i32
    return %c0_i32, %c0_i32_0 : i32, i32
  }
  func.func @transform_6(%arg0: i32) -> (i32, i32) {
    %c0_i32 = arith.constant 0 : i32
    %c0_i32_0 = arith.constant 0 : i32
    %c0_i32_1 = arith.constant 0 : i32
    return %c0_i32, %c0_i32_0 : i32, i32
  }
  func.func @transform_7(%arg0: i32) -> (i32, i32, i32) {
    %c0_i32 = arith.constant 0 : i32
    %c0_i32_0 = arith.constant 0 : i32
    %c0_i32_1 = arith.constant 0 : i32
    return %arg0, %c0_i32, %c0_i32_0 : i32, i32, i32
  }
}

</mosaic_0001>

<bundles_post_ra>
// kernel: tpu_custom_call.1
= control target key start
LH: loop header
LB: loop body
LE: loop exit
PB: predicated region body
PF: predicated region fallthrough
CT: control target
= control target key end

     0   :  { %12 = vsyncpa [#allocation4], 0  ;;  %s1734_s0 = inlined_call_operand.vmem [shape: f32[2,18,72], index: 0, kind: input, shape index: {}]   ;;  %s1735_s1 = inlined_call_operand.vmem [shape: bf16[3,72,64], index: 1, kind: input, shape index: {}]   ;;  %s1736_s2 = inlined_call_operand.vmem [shape: f32[1,64], index: 2, kind: input, shape index: {}]   ;;  %s1737_s3 = inlined_call_operand.vmem [shape: f32[1,64], index: 3, kind: input, shape index: {}]   ;;  %s1738_s4 = inlined_call_operand.vmem [shape: bf16[3,72,64], index: 4, kind: input, shape index: {}]   ;;  %s1739_s5 = inlined_call_operand.vmem [shape: f32[1,64], index: 5, kind: input, shape index: {}]   ;;  %s1740_s6 = inlined_call_operand.vmem [shape: f32[1,64], index: 6, kind: input, shape index: {}]   ;;  %s1741_s7 = inlined_call_operand.hbm [shape: f32[2,16,64], index: 7, kind: output, shape index: {}]  }
   0x1   :  { %14 = vsyncpa [#allocation4 + $0x1], 0  ;;  %s1459_s24 = smov 0   ;;  %s1461_s25 = smov 0  }
   0x2   :  { %s1463_s26 = smov 0   ;;  %s1465_s27 = smov 0  }
   0x3 LB: > { %s1480_s28 = sadd.s32 4294967295, %s1409_s27   ;;  %s1036_s29 = sadd.s32 4294967294, %s1409_s27   ;;  %s1409_s27 = sphi %s1465_s27, %s1747_s27   ;;  %s1405_s26 = sphi %s1463_s26, %s1746_s26   ;;  %s1401_s25 = sphi %s1461_s25, %s1745_s25   ;;  %s1397_s24 = sphi %s1459_s24, %s1744_s24  }
   0x4   : > { %s1484_s30 = sadd.s32 1, %s1409_s27   ;;  %s179_s8 = sadd.s32 1, %s1405_s26 }
   0x5   : > { %s176_s9 = ssub.s32 %s1409_s27, %s1484_s30  ;;  %p189_p0 = scmp.ne.s32.totalorder %s1405_s26, %s1401_s25 }
   0x6   : > { %p177_p1 = scmp.eq.s32.totalorder %s176_s9, 0  ;;  %p190_p2 = scmp.eq.s32.totalorder %s1480_s28, 1 }
   0x7   : > { %p195_p3 = scmp.ne.s32.totalorder %s1401_s25, %s1397_s24  ;;  %p196_p4 = scmp.eq.s32.totalorder %s1036_s29, 1 }
   0x8   : > { %s1495_s10 = scalar_select %p177_p1, %s1405_s26, %s179_s8  }
   0x9   : > { %p1497_p5 = por %p190_p2, %p189_p0  ;;  %p1501_p6 = por %p196_p4, %p195_p3 }
   0xa   : > { %p1039_p7 = scmp.ge.s32.totalorder %s1409_s27, 1  ;;  %p240_p8 = scmp.lt.s32.totalorder %s1409_s27, 3 }
   0xc   : > { %p241_p9 = pnand %p1039_p7, %p240_p8 }
   0xd   : > { %v1314_v0 = vld [vmem:[%s1735_s1 + $0x24] sm:$0xff] (!%p241_p9)   ;;  %v1411_v1 = vmov (!%p241_p9), 0.0   ;;  %v1315_v2 = vld [vmem:[%s1735_s1 + $0x2c] sm:$0xff] (!%p241_p9)   ;;  %vm1412_vm0 = vmmov (!%p241_p9), 0   ;;  %p272_p10 = scmp.lt.s32.totalorder (!%p241_p9), %s1480_s28, 1  ;;  %v1316_v3 = vld [vmem:[%s1735_s1 + $0x34] sm:$0xff] (!%p241_p9)  }
   0xe   : > { %244 = sbr.rel (%p241_p9) target bundleno = 715 (0x2cb), region = 48  ;;  %1167 = vmatprep.subr.bf16.mxu0 (!%p241_p9), %v1411_v1  ;;  %1209 = vmatprep.subr.bf16.mxu1 (!%p241_p9), %v1411_v1  ;;  %v1317_v4 = vld [vmem:[%s1735_s1 + $0x3c] sm:$0xff] (!%p241_p9)   ;;  %v1318_v8 = vld [vmem:[%s1735_s1 + $0x44] ss:$0 sps:$4 sm:$0xff] (!%p241_p9)   ;;  %vm346_vm1 = vcmask (!%p241_p9), 1043456   ;;  %vm342_vm3 = vcmask (!%p241_p9), 588800  }
   0xf   : > { %1168 = vmatpush3.bf16.msra.mxu0 (!%p241_p9), %v1314_v0  ;;  %1177 = vmatprep.mubr.msk.bf16.mxu0 (!%p241_p9), %vm1412_vm0, %v1411_v1  ;;  %v348_v14 = vsel (!%p241_p9), %vm346_vm1, %v1318_v8, 0  ;;  %vm302_vm2 = vsmask.f32 (!%p241_p9), 7424  ;;  %v1319_v18 = vld [vmem:[%s1735_s1] sm:$0xff] (!%p241_p9)   ;;  %v1320_v20 = vld [vmem:[%s1735_s1 + $0x8] sm:$0xff] (!%p241_p9)   ;;  %v1321_v21 = vld [vmem:[%s1735_s1 + $0x10] sm:$0xff] (!%p241_p9)  }
  0x10   : > { %1169 = vmatprep.subr.bf16.mxu0 (!%p241_p9), %v1411_v1  ;;  %1219 = vmatprep.mubr.msk.bf16.mxu1 (!%p241_p9), %vm1412_vm0, %v1411_v1  ;;  %v1322_v22 = vld [vmem:[%s1735_s1 + $0x18] sm:$0xff] (!%p241_p9)   ;;  %v1323_v23 = vld [vmem:[%s1735_s1 + $0x20] ss:$0 sps:$4 sm:$0xff] (!%p241_p9)   ;;  %v1324_v25 = vld [vmem:[%s1735_s1 + $0x48] sm:$0xff] (!%p241_p9)   ;;  %vm476_vm4 = vcmask (!%p241_p9), 1046528   ;;  %vm576_vm6 = vcmask (!%p241_p9), 581632  }
  0x11   : > { %v421_v24 = vsel (!%p241_p9), %vm346_vm1, %v1323_v23, 0  ;;  %v1325_v26 = vld [vmem:[%s1735_s1 + $0x50] sm:$0xff] (!%p241_p9)   ;;  %v1326_v27 = vld [vmem:[%s1735_s1 + $0x58] sm:$0xff] (!%p241_p9)   ;;  %v1327_v28 = vld [vmem:[%s1735_s1 + $0x60] sm:$0xff] (!%p241_p9)   ;;  %vm577_vm5 = vsmask.f32 (!%p241_p9), 256 }
  0x12   : > { %v1328_v29 = vld [vmem:[%s1735_s1 + $0x68] ss:$0 sps:$4 sm:$0xff] (!%p241_p9)   ;;  %v579_v34 = vld [vmem:[#allocation2] sm:$0x1] (!%p241_p9)  ;;  %vm582_vm7 = vsmask.f32 (!%p241_p9), 7938  ;;  %vm578_vm8 = vmand (!%p241_p9), %vm576_vm6, %vm577_vm5 }
  0x13   : > { %1170 = vmatpush3.bf16.msra.mxu0 (!%p241_p9), %v1315_v2  ;;  %v511_v32 = vsel (!%p241_p9), %vm346_vm1, %v1328_v29, 0  ;;  %v584_v35 = vld [vmem:[#allocation2 + $0x8] sm:$0x1] (!%p241_p9)  ;;  %vm587_vm9 = vcmask (!%p241_p9), 27648   ;;  %v580_v36 = vsel (!%p241_p9), %vm578_vm8, 0, %v579_v34  ;;  %vm583_vm10 = vmand (!%p241_p9), %vm576_vm6, %vm582_vm7  ;;  %vm590_vm11 = vcmask (!%p241_p9), 24576  }
  0x14   : > { %1171 = vmatprep.subr.bf16.mxu0 (!%p241_p9), %v1411_v1  ;;  %vm592_vm12 = vcmask (!%p241_p9), 585248   ;;  %v1413_v37 = vmov (!%p241_p9), 0   ;;  %581 = vst [vmem:[#allocation2] sm:$0x1] (!%p241_p9), %v580_v36  ;;  %v585_v38 = vsel (!%p241_p9), %vm583_vm10, 0, %v584_v35  ;;  %vm595_vm13 = vcmask (!%p241_p9), 582176  }
  0x15   : > { %s273_s17 = scalar_select %p272_p10, %s1480_s28, 1  ;;  %589 = vst.msk [vmem:[#allocation2 + $0x4] sm:$0xf] %vm587_vm9, %v1413_v37  ;;  %586 = vst [vmem:[#allocation2 + $0x8] sm:$0x1] %v585_v38  ;;  %v1329_v44 = vld [vmem:[%s1738_s4 + $0x24] sm:$0xff]  }
  0x16   : > { %594 = vst.msk [vmem:[#allocation2 + $0x4] sm:$0xf] %vm592_vm12, %v1413_v37  ;;  %v1078_v39 = vld [vmem:[%s1736_s2] ss:$0 sm:$0xff]  ;;  %1210 = vmatpush3.bf16.msra.mxu1 %v1329_v44  ;;  %v1330_v51 = vld [vmem:[%s1738_s4 + $0x2c] sm:$0xff]   ;;  %v1331_v54 = vld [vmem:[%s1738_s4 + $0x34] sm:$0xff]  }
  0x17   : > { %s1267_s20 = smul.u32 24, %s273_s17  ;;  %1172 = vmatpush3.bf16.msra.mxu0 %v1316_v3  ;;  %588 = vst.msk [vmem:[#allocation2] sm:$0xf] %vm587_vm9, %v1413_v37  ;;  %v1079_v41 = vld [vmem:[%s1737_s3] ss:$0 sm:$0xff]  ;;  %1211 = vmatprep.subr.bf16.mxu1 %v1411_v1  ;;  %s1414_s22 = smov 4  }
  0x18   : > { %1173 = vmatprep.subr.bf16.mxu0 %v1411_v1  ;;  %591 = vst.msk [vmem:[#allocation2 + $0x8] sm:$0x1] %vm590_vm11, %v1413_v37  ;;  %vm603_vm14 = vsmask.f32 4368  ;;  %v1332_v60 = vld [vmem:[%s1738_s4 + $0x3c] sm:$0xff]   ;;  %s1415_s23 = smov 124  }
  0x19   : > { %s1532_s8 = scalar_lea.vmem %s1734_s0, %s1267_s20  ;;  %593 = vst.msk [vmem:[#allocation2] sm:$0xf] %vm592_vm12, %v1413_v37  ;;  %v1333_v61 = vld [vmem:[%s1738_s4 + $0x44] ss:$0 sps:$4 sm:$0xff]   ;;  %vm604_vm15 = vmor %vm577_vm5, %vm603_vm14  ;;  %vm631_vm6 = vcmask 551968   ;;  %vm638_vm8 = vcmask 548896  }
  0x1a   : > { %v278_v5 = vld [vmem:[%s1532_s8] sm:$0xff]  ;;  %v279_v6 = vld [vmem:[%s1532_s8 + $0x8] sm:$0xff]  ;;  %v280_v7 = vld [vmem:[%s1532_s8 + $0x10] sm:$0x3]  ;;  %596 = vst.msk [vmem:[#allocation2 + $0x8] sm:$0x1] %vm595_vm13, %v1413_v37  ;;  %1212 = vmatpush3.bf16.msra.mxu1 %v1330_v51 }
  0x1b   : > { %v281_v9 = vpack.c.bf16 %v279_v6, %v278_v5  ;;  %v282_v10 = vpack.c.bf16 %v280_v7, %v280_v7  ;;  %1174 = vmatpush3.bf16.msra.mxu0 %v1317_v4  ;;  %1213 = vmatprep.subr.bf16.mxu1 %v1411_v1  ;;  %v716_v5 = vsel %vm346_vm1, %v1333_v61, 0  ;;  %v943_v7 = vld [vmem:[%s1532_s8 + $0x1] sm:$0xff]  ;;  %v944_v8 = vld [vmem:[%s1532_s8 + $0x9] sm:$0xff]  ;;  %vm632_vm9 = vmand %vm631_vm6, %vm582_vm7  ;;  %s269_s16 = sand.u32 1, %s1401_s25   ;;  %s1130_s8 = sshll.u32 %s1480_s28, 8 }
  0x1c   : > { %1175 = vmatprep.subr.bf16.mxu0 %v1411_v1  ;;  %vm639_vm10 = vmand %vm638_vm8, %vm577_vm5  ;;  %v1338_v29 = vld [vmem:[%s1738_s4 + $0x10] sm:$0xff]   ;;  %v1343_v35 = vld [vmem:[%s1738_s4 + $0x58] sm:$0xff]   ;;  %s1040_s19 = sshll.u32 %s269_s16, 4  ;;  %s1691_s13 = scalar_lea.hbm %s1741_s7, %s1130_s8 }
  0x1d   : > { %v304_v11 = vshrl.u32 %v281_v9, 16  ;;  %v306_v12 = vshll.u32 %v281_v9, 16  ;;  %v311_v13 = vshll.u32 %v282_v10, 16  ;;  %v477_v30 = vrot.slane %v281_v9, 1  ;;  %v1342_v34 = vld [vmem:[%s1738_s4 + $0x50] sm:$0xff]   ;;  %v1344_v36 = vld [vmem:[%s1738_s4 + $0x60] sm:$0xff]  }
  0x1e   : > { %v478_v31 = vrot.slane %v282_v10, 1  ;;  %1214 = vmatpush3.bf16.msra.mxu1 %v1331_v54  ;;  %v1345_v37 = vld [vmem:[%s1738_s4 + $0x68] ss:$0 sps:$4 sm:$0xff]   ;;  %v1121_v44 = vld [vmem:[%s1739_s5] ss:$0 sm:$0xff]  ;;  %s1693_s14 = scalar_lea.sflag [#allocation4], %s269_s16 }
  0x1f   : > { %v308_v15 = vrot.slane %v306_v12, 1  ;;  %v313_v16 = vrot.slane %v311_v13, 1  ;;  %1176 = vmatpush3.bf16.msra.mxu0 %v348_v14  ;;  %1215 = vmatprep.subr.bf16.mxu1 %v1411_v1  ;;  %s1416_s28 = smov [#allocation3]  }
  0x20   : > { %1181 = vmatprep.subr.bf16.mxu0 %v1411_v1  ;;  %v479_v33 = vsel %vm476_vm4, %v477_v30, %v478_v31  ;;  %v1339_v30 = vld [vmem:[%s1738_s4 + $0x18] sm:$0xff]   ;;  %v1340_v31 = vld [vmem:[%s1738_s4 + $0x20] ss:$0 sps:$4 sm:$0xff]   ;;  %s1351_s17 = sshll.u32 %s1416_s28, 4  ;;  %s1352_s17 = int_to_ptr.vmem [resolvable:$false] %s1351_s17 }
  0x21   : > { %v309_v17 = vor.u32 %v308_v15, %v304_v11  ;;  %v640_v11 = vld [vmem:[#allocation2 + $0x8] sm:$0x1]  ;;  %s1353_s18 = scalar_lea.vmem %s1352_s17, 512 }
  0x22   : > { %1216 = vmatpush3.bf16.msra.mxu1 %v1332_v60 }
  0x23   : > { %v314_v19 = vsel %vm302_vm2, %v309_v17, %v313_v16  ;;  %1217 = vmatprep.subr.bf16.mxu1 %v1411_v1 }
  0x24   : > { %1178 = vmatmul.mubr.msk.bf16.vlgmr.msra.gmra.mrb[0].mxu0 %vm342_vm3, %v314_v19 }
  0x25   : > { %1182 = vmatpush3.bf16.msra.mxu0 %v1319_v18  ;;  %1191 = vmatprep.mubr.msk.bf16.mxu0 %vm1412_vm0, %v1411_v1 }
  0x26   : > { %1183 = vmatprep.subr.bf16.mxu0 %v1411_v1  ;;  %1218 = vmatpush3.bf16.msra.mxu1 %v716_v5 }
  0x27   : > { %1223 = vmatprep.subr.bf16.mxu1 %v1411_v1 }
  0x29   : > { %1184 = vmatpush3.bf16.msra.mxu0 %v1320_v20 }
  0x2a   : > { %1185 = vmatprep.subr.bf16.mxu0 %v1411_v1 }
  0x2d   : > { %1186 = vmatpush3.bf16.msra.mxu0 %v1321_v21 }
  0x2e   : > { %1187 = vmatprep.subr.bf16.mxu0 %v1411_v1 }
  0x31   : > { %1188 = vmatpush3.bf16.msra.mxu0 %v1322_v22 }
  0x32   : > { %1189 = vmatprep.subr.bf16.mxu0 %v1411_v1 }
  0x35   : > { %1190 = vmatpush3.bf16.msra.mxu0 %v421_v24 }
  0x36   : > { %1195 = vmatprep.subr.bf16.mxu0 %v1411_v1 }
  0x38   : > { %1192 = vmatmul.mubr.msk.bf16.vlgmr.msra.gmra.mrb[0].mxu0 %vm342_vm3, %v281_v9  ;;  %v633_v9 = vld [vmem:[#allocation2] sm:$0xf] }
  0x39   : > { %1196 = vmatpush3.bf16.msra.mxu0 %v1324_v25  ;;  %1205 = vmatprep.mubr.msk.bf16.mxu0 %vm1412_vm0, %v1411_v1 }
  0x3a   : > { %1197 = vmatprep.subr.bf16.mxu0 %v1411_v1 }
  0x3d   : > { %1198 = vmatpush3.bf16.msra.mxu0 %v1325_v26  ;;  %v1336_v26 = vld [vmem:[%s1738_s4] sm:$0xff]  }
  0x3e   : > { %1199 = vmatprep.subr.bf16.mxu0 %v1411_v1 }
  0x41   : > { %1200 = vmatpush3.bf16.msra.mxu0 %v1326_v27 }
  0x42   : > { %1201 = vmatprep.subr.bf16.mxu0 %v1411_v1 }
  0x45   : > { %1202 = vmatpush3.bf16.msra.mxu0 %v1327_v28  ;;  %v1337_v28 = vld [vmem:[%s1738_s4 + $0x8] sm:$0xff]  }
  0x46   : > { %1203 = vmatprep.subr.bf16.mxu0 %v1411_v1 }
  0x49   : > { %1204 = vmatpush3.bf16.msra.mxu0 %v511_v32  ;;  %v789_v32 = vsel %vm346_vm1, %v1340_v31, 0 }
  0x4c   : > { %1206 = vmatmul.mubr.msk.bf16.vlgmr.msra.gmra.mrb[0].mxu0 %vm342_vm3, %v479_v33  ;;  %v1341_v33 = vld [vmem:[%s1738_s4 + $0x48] sm:$0xff]  }
 0x11f   : > { %v547_v40 = vpop.f32.mrb[0].mxu0 }
 0x120   : > { %v563_v42 = vmul.f32 %v1078_v39, %v547_v40  ;;  %v1207_v43 = vpop.f32.mrb[1].mxu0  ;;  %v880_v40 = vsel %vm346_vm1, %v1345_v37, 0 }
 0x121   : > { %v550_v45 = vpop.f32.mrb[2].mxu0 }
 0x122   : > { %v572_v46 = vadd.f32 %v1079_v41, %v563_v42  ;;  %v564_v47 = vmul.f32 %v1078_v39, %v550_v45  ;;  %v1208_v48 = vpop.f32.mrb[3].mxu0 }
 0x124   : > { %v574_v49 = vmax.f32 %v572_v46, 0.0  ;;  %v573_v50 = vadd.f32 %v1079_v41, %v564_v47 }
 0x126   : > { %v1128_v52 = vpack.c.bf16 %v574_v49, %v574_v49  ;;  %v575_v53 = vmax.f32 %v573_v50, 0.0 }
 0x128   : > { %v1129_v55 = vpack.c.bf16 %v575_v53, %v575_v53  ;;  %v606_v56 = vshrl.u32 %v1128_v52, 16  ;;  %v609_v58 = vshll.u32 %v1128_v52, 16 }
 0x12a   : > { %v608_v57 = vrot.slane %v606_v56, 7  ;;  %v614_v59 = vshrl.u32 %v1129_v55, 16  ;;  %v617_v62 = vshll.u32 %v1129_v55, 16 }
 0x12c   : > { %v611_v63 = vor.u32 %v609_v58, %v608_v57  ;;  %v616_v0 = vrot.slane %v614_v59, 7  ;;  %v612_v2 = vrot.slane %v608_v57, 4 }
 0x12e   : > { %622 = vrot.lane.b32.xlu0 %v611_v63, %s1414_s22  ;;  %v621_v3 = vrot.slane %v616_v0, 4  ;;  %v619_v4 = vor.u32 %v617_v62, %v616_v0 }
 0x130   : > { %626 = vrot.lane.b32.xlu1 %v621_v3, %s1414_s22  ;;  %v620_v6 = vsel %vm604_vm15, %v612_v2, %v619_v4 }
 0x132   : > { %624 = vrot.lane.b32.xlu0 %v620_v6, %s1414_s22  ;;  %s271_s22 = scalar_lea.vmem [#allocation3], %s1040_s19 }
 0x134   : > { %947 = vrot.lane.b32.xlu1 %v943_v7, %s1415_s23 }
 0x136   : > { %949 = vrot.lane.b32.xlu0 %v944_v8, %s1415_s23  ;;  %s974_s23 = sshll.u32 %s271_s22, 4  ;;  %s1686_s23 = int_to_ptr.vmem [resolvable:$true] %s974_s23 }
 0x137   : > { %s1347_s15 = scalar_lea.vmem %s1686_s23, 256  ;;  %p1354_p0 = scmp.lt.s32.totalorder %s1686_s23, %s1352_s17 }
 0x138   : > { %p1348_p11 = scmp.ne.s32.totalorder %s1686_s23, %s1347_s15  ;;  %p1355_p1 = scmp.lt.s32.totalorder %s1353_s18, %s1347_s15 }
 0x13a   : > { %p1349_p12 = pnand %p1348_p11, %p1497_p5  ;;  %p1356_p2 = por %p1355_p1, %p1354_p0 }
 0x13c   : > { %p1350_p13 = pneg %p1349_p12 }
 0x13e   : > { %p1357_p3 = pnand %p1356_p2, %p1350_p13 }
 0x1a0   : > { %v623_v10 = vpop.permute.xlu0 %622 }
 0x1a1   : > { %v634_v12 = vsel %vm632_vm9, %v623_v10, %v633_v9 }
 0x1a2   : > { %635 = vst [vmem:[#allocation2] sm:$0xf] %v634_v12  ;;  %v627_v13 = vpop.permute.xlu1 %626 }
 0x1a3   : > { %v641_v14 = vsel %vm639_vm10, %v627_v13, %v640_v11 }
 0x1a4   : > { %642 = vst [vmem:[#allocation2 + $0x8] sm:$0x1] %v641_v14  ;;  %v625_v15 = vpop.permute.xlu0 %624 }
 0x1a5   : > { %637 = vst.msk [vmem:[#allocation2 + $0x4] sm:$0xf] %vm631_vm6, %v625_v15 }
 0x1a6   : > { %v948_v49 = vpop.permute.xlu1 %947 }
 0x1a8   : > { %v950_v53 = vpop.permute.xlu0 %949 }
 0x1a9   : > { %v643_v17 = vld [vmem:[#allocation2] sm:$0xf] }
 0x1aa   : > { %v832_v38 = vld [vmem:[#allocation2] sm:$0xe] }
 0x1ab   : > { %v1335_v16 = vld [vmem:[#allocation2 + $0x8] ss:$0 sps:$4 sm:$0x11]  }
 0x1ac   : > { %v644_v18 = vld [vmem:[#allocation2 + $0x4] sm:$0xf]  ;;  %v681_v21 = vshll.u32 %v1335_v16, 16  ;;  %v847_v42 = vrot.slane %v1335_v16, 1 }
 0x1ad   : > { %v1091_v19 = vcombine.low %v643_v17, %v644_v18  ;;  %v1114_v39 = vcombine.low %v832_v38, %v644_v18 }
 0x1ae   : > { %v683_v25 = vrot.slane %v681_v21, 1 }
 0x1af   : > { %v676_v20 = vshll.u32 %v1091_v19, 16  ;;  %v674_v22 = vshrl.u32 %v1091_v19, 16  ;;  %v846_v41 = vrot.slane %v1114_v39, 1 }
 0x1b1   : > { %v678_v23 = vrot.slane %v676_v20, 1  ;;  %v848_v43 = vsel %vm476_vm4, %v846_v41, %v847_v42 }
 0x1b3   : > { %v679_v24 = vor.u32 %v678_v23, %v674_v22 }
 0x1b5   : > { %v684_v27 = vsel %vm302_vm2, %v679_v24, %v683_v25 }
 0x1b6   : > { %1220 = vmatmul.mubr.msk.bf16.vlgmr.msra.gmra.mrb[0].mxu1 %vm342_vm3, %v684_v27 }
 0x1b7   : > { %1224 = vmatpush3.bf16.msra.mxu1 %v1336_v26  ;;  %1233 = vmatprep.mubr.msk.bf16.mxu1 %vm1412_vm0, %v1411_v1 }
 0x1b8   : > { %1225 = vmatprep.subr.bf16.mxu1 %v1411_v1 }
 0x1bb   : > { %1226 = vmatpush3.bf16.msra.mxu1 %v1337_v28 }
 0x1bc   : > { %1227 = vmatprep.subr.bf16.mxu1 %v1411_v1 }
 0x1bf   : > { %1228 = vmatpush3.bf16.msra.mxu1 %v1338_v29 }
 0x1c0   : > { %1229 = vmatprep.subr.bf16.mxu1 %v1411_v1 }
 0x1c3   : > { %1230 = vmatpush3.bf16.msra.mxu1 %v1339_v30 }
 0x1c4   : > { %1231 = vmatprep.subr.bf16.mxu1 %v1411_v1 }
 0x1c7   : > { %1232 = vmatpush3.bf16.msra.mxu1 %v789_v32 }
 0x1c8   : > { %1237 = vmatprep.subr.bf16.mxu1 %v1411_v1 }
 0x1ca   : > { %1234 = vmatmul.mubr.msk.bf16.vlgmr.msra.gmra.mrb[0].mxu1 %vm342_vm3, %v1091_v19 }
 0x1cb   : > { %1238 = vmatpush3.bf16.msra.mxu1 %v1341_v33  ;;  %1247 = vmatprep.mubr.msk.bf16.mxu1 %vm1412_vm0, %v1411_v1  ;;  %vm957_vm0 = vcmask 523264  }
 0x1cc   : > { %1239 = vmatprep.subr.bf16.mxu1 %v1411_v1 }
 0x1cf   : > { %1240 = vmatpush3.bf16.msra.mxu1 %v1342_v34 }
 0x1d0   : > { %1241 = vmatprep.subr.bf16.mxu1 %v1411_v1 }
 0x1d3   : > { %1242 = vmatpush3.bf16.msra.mxu1 %v1343_v35 }
 0x1d4   : > { %1243 = vmatprep.subr.bf16.mxu1 %v1411_v1 }
 0x1d7   : > { %1244 = vmatpush3.bf16.msra.mxu1 %v1344_v36 }
 0x1d8   : > { %1245 = vmatprep.subr.bf16.mxu1 %v1411_v1  ;;  %v1122_v1 = vld [vmem:[%s1740_s6] ss:$0 sm:$0xff] }
 0x1db   : > { %1246 = vmatpush3.bf16.msra.mxu1 %v880_v40 }
 0x1de   : > { %1248 = vmatmul.mubr.msk.bf16.vlgmr.msra.gmra.mrb[0].mxu1 %vm342_vm3, %v848_v43 }
 0x2b1   : > { %v916_v45 = vpop.f32.mrb[0].mxu1 }
 0x2b2   : > { %v932_v46 = vmul.f32 %v1121_v44, %v916_v45  ;;  %v1249_v47 = vpop.f32.mrb[1].mxu1 }
 0x2b3   : > { %v919_v48 = vpop.f32.mrb[2].mxu1 }
 0x2b4   : > { %v933_v50 = vmul.f32 %v1121_v44, %v919_v48  ;;  %v1250_v51 = vpop.f32.mrb[3].mxu1  ;;  %v941_v52 = vadd.f32 %v1122_v1, %v932_v46 }
 0x2b6   : > { %v953_v54 = vadd.f32 %v948_v49, %v941_v52  ;;  %v942_v55 = vadd.f32 %v1122_v1, %v933_v50 }
 0x2b8   : > { %v955_v56 = vmax.f32 %v953_v54, 0.0  ;;  %v954_v57 = vadd.f32 %v950_v53, %v942_v55 }
 0x2ba   : > { %958 = vst.msk [vmem:[%s271_s22] sm:$0xff] %vm957_vm0, %v955_v56  ;;  %v956_v58 = vmax.f32 %v954_v57, 0.0 }
 0x2bc   : > { %959 = vst.msk [vmem:[%s271_s22 + $0x8] sm:$0xff] %vm957_vm0, %v956_v58 }
 0x2bd   : > { %1360 = shalt.err (!%p1357_p3)
}
 0x2be   : > { %s1361_s16 = scalar_lea.hbm %s1691_s13, 256  ;;  %s1365_s21 = scalar_lea.hbm %s1741_s7, 512 }
 0x2bf   : > { %p1362_p4 = scmp.ne.s32.totalorder %s1691_s13, %s1361_s16  ;;  %p1366_p9 = scmp.lt.u32.totalorder %s1691_s13, %s1741_s7 }
 0x2c0   : > { %p1367_p10 = scmp.lt.u32.totalorder %s1365_s21, %s1361_s16  ;;  %p1369_p12 = scmp.lt.u32.totalorder %s1361_s16, %s1691_s13 }
 0x2c1   : > { %p1363_p7 = pnand %p1362_p4, %p1497_p5 }
 0x2c2   : > { %p1368_p11 = por %p1367_p10, %p1366_p9 }
 0x2c3   : > { %p1364_p8 = pneg %p1363_p7 }
 0x2c4   : > { %p1370_p13 = por %p1369_p12, %p1368_p11 }
 0x2c6   : > { %p1371_p0 = pnand %p1370_p13, %p1364_p8 }
 0x2c8   : > { %1374 = shalt.err (!%p1371_p0)
}
 0x2c9   : > { %s1417_s29 = smov 128   ;;  %s1418_s9 = smov 8  }
 0x2ca   : > { %1268 = dma.vmem_to_hbm [thread:$0]  (%p1497_p5), %s1686_s23, 256, %s1691_s13, %s1693_s14, %s1417_s29, %s1417_s29, %s1418_s9  }
 0x2cb PF: > { %p1274_p1 = scmp.ge.s32.totalorder %s1409_s27, 2  ;;  %s989_s15 = sand.u32 1, %s1397_s24  }
 0x2cc   : > { %s990_s28 = scalar_lea.sflag [#allocation4], %s989_s15 }
 0x2cd   : > { %p1271_p2 = pnand %p1274_p1, %p1501_p6 }
 0x2cf   : > { %1392 = dma.done.wait (!%p1271_p2), %s990_s28, 256  }
 0x2d0   : > { %1394 = vsyncadd (!%p1271_p2), %s990_s28, 4294967040  ;;  %p17_p3 = scmp.ge.s32.totalorder %s1484_s30, 4   ;;  %s1744_s24 = smov %s1401_s25 }
 0x2d1   : > { %s1745_s25 = smov %s1405_s26  ;;  %s1746_s26 = smov %s1495_s10 }
 0x2d2   : > { %s1747_s27 = smov %s1484_s30  ;;  %19 = sbr.rel (!%p17_p3) target bundleno = 3 (0x3), region = 87 }
 0x2d9   :  { %995 = vsyncpa [#allocation4], 1 }
 0x2da   :  { %997 = vsyncpa [#allocation4 + $0x1], 1 }

</bundles_post_ra>
